<compile_context>
chip_gen: v7x
topology: tpu7x:2x2x1
jax: 0.10.0
libtpu: 0.0.40
codegen_flags: <defaults>
</compile_context>

<pallas_src>
import functools

import jax
import jax.numpy as jnp
from jax.experimental import pallas as pl
from jax.experimental.pallas import tpu as pltpu


def _round_up(n, m):
    return ((n + m - 1) // m) * m


def _lstm_model_kernel(act_ref, w_ref, b_ref, out_ref, *,
                       H, K1p, K2, K3, out_size):
    r1 = K1p            # end of cell-1 weight rows
    r2 = K1p + K2       # end of cell-2 weight rows
    r3 = K1p + K2 + K3  # end of fc weight rows

    x1 = act_ref[0:1, 0:K1p]     # (1, K1p)  [signal | input | h0 | 0-pad]
    c0 = act_ref[1:2, 0:H]       # (1, H)

    # ---- LSTMCell 1: fused [x, h0] @ [W_ih ; W_hh]^T ----
    gates1 = (jnp.dot(x1, w_ref[0:r1, :], preferred_element_type=jnp.float32)
              + b_ref[0:1, :])                    # (1, 4H), gate order i,f,g,o
    sg1 = jax.nn.sigmoid(gates1)                  # one full-vreg EUP pass
    i1 = sg1[:, 0:H]
    f1 = sg1[:, H:2 * H]
    o1 = sg1[:, 3 * H:4 * H]
    g1 = jnp.tanh(gates1[:, 2 * H:3 * H])         # tanh only on g slice
    c1 = f1 * c0 + i1 * g1
    h1 = o1 * jnp.tanh(c1)

    # ---- ReLU + LSTMCell 2: fused [relu(h1), h1] @ [W_ih ; W_hh]^T ----
    x2 = jnp.concatenate([jnp.maximum(h1, 0.0), h1], axis=1)   # (1, 2H)
    gates2 = (jnp.dot(x2, w_ref[r1:r2, :], preferred_element_type=jnp.float32)
              + b_ref[1:2, :])
    sg2 = jax.nn.sigmoid(gates2)
    i2 = sg2[:, 0:H]
    f2 = sg2[:, H:2 * H]
    o2 = sg2[:, 3 * H:4 * H]
    g2 = jnp.tanh(gates2[:, 2 * H:3 * H])
    c2 = f2 * c1 + i2 * g2
    h2 = o2 * jnp.tanh(c2)

    # ---- Linear + LogSoftmax over the full lane-padded row ----
    # padded fc bias lanes are -inf  ->  exp() contributes 0, result exact.
    logits = (jnp.dot(h2, w_ref[r2:r3, :], preferred_element_type=jnp.float32)
              + b_ref[2:3, :])                    # (1, 4H)
    m = jnp.max(logits, axis=1, keepdims=True)
    lse = m + jnp.log(jnp.sum(jnp.exp(logits - m), axis=1, keepdims=True))
    logp = (logits - lse)[:, 0:out_size]          # drop -inf padded lanes

    # ---- single lane-dense packed output: [logp | h2 | c2 | zero pad] ----
    pieces = [logp, h2, c2]
    pad = out_ref.shape[1] - (out_size + 2 * H)
    if pad > 0:
        pieces.append(jnp.zeros((1, pad), jnp.float32))
    out_ref[...] = jnp.concatenate(pieces, axis=1)


def lstm_model_forward(signal, inp, initstate, params):
    """signal: any shape with 7 elements; inp: (1, input_size);
       initstate: None or (hx, cx), each (1, hidden_size)."""
    H = params["hidden_size"]
    out_size = params["output_size"]
    K1, K1p, K2, K3 = params["K1"], params["K1p"], params["K2"], params["K3"]

    if initstate is None:
        hx = jnp.zeros((1, H), jnp.float32)
        cx = jnp.zeros((1, H), jnp.float32)
    else:
        hx, cx = initstate

    sig = jnp.reshape(signal, (1, -1)).astype(jnp.float32)   # flatten + unsqueeze(0)
    x1 = jnp.concatenate(
        [sig, inp.astype(jnp.float32), hx.astype(jnp.float32)], axis=1)   # (1, K1)

    # single packed activation/state operand: row0 = [x1 | 0], row1 = [c0 | 0]
    act_w = _round_up(max(K1p, H), 128)
    act = jnp.zeros((2, act_w), jnp.float32)
    act = act.at[0, :K1].set(x1[0])
    act = act.at[1, :H].set(cx.astype(jnp.float32)[0])

    packed = out_size + 2 * H
    packed_w = _round_up(packed, 128)             # lane-dense full-vreg output row

    vmem = pl.BlockSpec(memory_space=pltpu.MemorySpace.VMEM)
    kernel = functools.partial(_lstm_model_kernel, H=H, K1p=K1p, K2=K2, K3=K3,
                               out_size=out_size)

    packed_out = pl.pallas_call(
        kernel,
        out_shape=jax.ShapeDtypeStruct((1, packed_w), jnp.float32),
        in_specs=[vmem, vmem, vmem],
        out_specs=vmem,
    )(act, params["w"], params["b"])

    out = packed_out[:, :out_size]
    h_new = packed_out[:, out_size:out_size + H]
    c_new = packed_out[:, out_size + H:out_size + 2 * H]
    return out, (h_new, c_new)


def init_params(key, input_size, hidden_size, output_size):
    """PyTorch-style init; all weights fused/padded into one (rows, 4H) slab
       and all biases into one (3, 4H) slab so the kernel takes 3 operands."""
    H = hidden_size
    in1 = input_size + 7
    K1 = in1 + H                    # cell-1 fused GEMV K dim
    K1p = _round_up(K1, 8)          # sublane-aligned
    K2 = 2 * H                      # cell-2 fused GEMV K dim
    K3 = H                          # fc GEMV K dim
    NL = 4 * H                      # lane width of the slab (= gate width)
    assert output_size <= NL

    ks = jax.random.split(key, 10)

    def u(k, shape, bound):
        return jax.random.uniform(k, shape, jnp.float32, -bound, bound)

    b_lstm = 1.0 / jnp.sqrt(jnp.float32(H))
    # LSTMCell 1: weight_ih (4H, in1), weight_hh (4H, H), biases (4H,)
    wih1 = u(ks[0], (4 * H, in1), b_lstm)
    whh1 = u(ks[1], (4 * H, H), b_lstm)
    b1 = u(ks[2], (4 * H,), b_lstm) + u(ks[3], (4 * H,), b_lstm)
    # LSTMCell 2
    wih2 = u(ks[4], (4 * H, H), b_lstm)
    whh2 = u(ks[5], (4 * H, H), b_lstm)
    b2 = u(ks[6], (4 * H,), b_lstm) + u(ks[7], (4 * H,), b_lstm)
    # Linear
    b_fc = 1.0 / jnp.sqrt(jnp.float32(H))
    wfc = u(ks[8], (output_size, H), b_fc)
    bfc = u(ks[9], (output_size,), b_fc)

    # Fused GEMV weights:  [x, h] @ concat(W_ih, W_hh, axis=1).T
    w1 = jnp.concatenate([wih1, whh1], axis=1).T            # (K1, 4H)
    w1 = jnp.pad(w1, ((0, K1p - K1), (0, 0)))                # (K1p, 4H)
    w2 = jnp.concatenate([wih2, whh2], axis=1).T             # (2H, 4H)
    wfc_p = jnp.pad(wfc.T, ((0, 0), (0, NL - output_size)))  # (H, 4H) lane-padded

    w_slab = jnp.concatenate([w1, w2, wfc_p], axis=0)        # (K1p+K2+K3, 4H)

    bfc_p = jnp.concatenate(
        [bfc.reshape(1, output_size),
         jnp.full((1, NL - output_size), -jnp.inf, jnp.float32)], axis=1)
    b_slab = jnp.concatenate(
        [b1.reshape(1, NL), b2.reshape(1, NL), bfc_p], axis=0)  # (3, 4H)

    return dict(w=w_slab, b=b_slab, hidden_size=H, input_size=input_size,
                output_size=output_size, K1=K1, K1p=K1p, K2=K2, K3=K3, NL=NL)


def _reference_forward(signal, inp, initstate, params):
    """Pure-JAX reference built from the same packed slabs."""
    H = params["hidden_size"]
    out_size = params["output_size"]
    K1, K1p, K2 = params["K1"], params["K1p"], params["K2"]
    w, b = params["w"], params["b"]

    if initstate is None:
        hx = jnp.zeros((1, H), jnp.float32)
        cx = jnp.zeros((1, H), jnp.float32)
    else:
        hx, cx = initstate

    def cell(gates, c_prev):
        i = jax.nn.sigmoid(gates[:, 0:H])
        f = jax.nn.sigmoid(gates[:, H:2 * H])
        g = jnp.tanh(gates[:, 2 * H:3 * H])
        o = jax.nn.sigmoid(gates[:, 3 * H:4 * H])
        c = f * c_prev + i * g
        return o * jnp.tanh(c), c

    sig = jnp.reshape(signal, (1, -1)).astype(jnp.float32)
    x = jnp.concatenate([sig, inp.astype(jnp.float32), hx], axis=1)
    xp = jnp.pad(x, ((0, 0), (0, K1p - K1)))
    h1, c1 = cell(xp @ w[:K1p] + b[0:1], cx)
    x2 = jnp.concatenate([jax.nn.relu(h1), h1], axis=1)
    h2, c2 = cell(x2 @ w[K1p:K1p + K2] + b[1:2], c1)
    logits = (h2 @ w[K1p + K2:])[:, :out_size] + b[2:3, :out_size]
    logp = jax.nn.log_softmax(logits, axis=1)
    return logp, (h2, c2)


if __name__ == "__main__":
    input_size, hidden_size, output_size = 16, 32, 16

    key = jax.random.PRNGKey(0)
    kp, ks, ki = jax.random.split(key, 3)

    params = init_params(kp, input_size, hidden_size, output_size)

    signal = jax.random.normal(ks, (7,), jnp.float32)          # flattened to 7 elems
    inp = jax.random.normal(ki, (1, input_size), jnp.float32)

    out, (hx, cx) = lstm_model_forward(signal, inp, None, params)
    jax.block_until_ready((out, hx, cx))

    assert out.shape == (1, output_size)
    assert hx.shape == (1, hidden_size) and cx.shape == (1, hidden_size)
    # log-softmax sanity: row sums to 1 in prob space
    assert abs(float(jnp.sum(jnp.exp(out))) - 1.0) < 1e-4

    # numerical check against a pure-JAX reference
    ref_out, (ref_h, ref_c) = _reference_forward(signal, inp, None, params)
    assert jnp.allclose(out, ref_out, atol=1e-5, rtol=1e-5)
    assert jnp.allclose(hx, ref_h, atol=1e-5, rtol=1e-5)
    assert jnp.allclose(cx, ref_c, atol=1e-5, rtol=1e-5)

    print("KERNEL_OK")
</pallas_src>

<mosaic_0001>
module attributes {stable_mosaic.version = 11 : i64} {
  func.func @_lstm_model_kernel(%arg0: memref<2x128xf32, #tpu.memory_space<vmem>>, %arg1: memref<152x128xf32, #tpu.memory_space<vmem>>, %arg2: memref<3x128xf32, #tpu.memory_space<vmem>>, %arg3: memref<1x128xf32, #tpu.memory_space<vmem>>) attributes {dimension_semantics = [], scalar_prefetch = 0 : i64, scratch_operands = 0 : i64, tpu.core_type = #tpu.core_type<tc>} {
    %c0 = arith.constant 0 : index
    %c0_0 = arith.constant 0 : index
    %0 = vector.load %arg0[%c0, %c0_0] : memref<2x128xf32, #tpu.memory_space<vmem>>, vector<1x56xf32>
    %c1 = arith.constant 1 : index
    %c0_1 = arith.constant 0 : index
    %1 = vector.load %arg0[%c1, %c0_1] : memref<2x128xf32, #tpu.memory_space<vmem>>, vector<1x32xf32>
    %c0_2 = arith.constant 0 : index
    %c0_3 = arith.constant 0 : index
    %2 = vector.load %arg1[%c0_2, %c0_3] : memref<152x128xf32, #tpu.memory_space<vmem>>, vector<56x128xf32>
    %cst = arith.constant dense<0.000000e+00> : vector<1x128xf32>
    %3 = tpu.matmul %0, %2, %cst {dimension_numbers = #tpu.dot_dimension_numbers<[1], [0], [0], [1], [0, 0, 1, 1], [], []>} : vector<1x56xf32>, vector<56x128xf32>, vector<1x128xf32> -> vector<1x128xf32>
    %c0_4 = arith.constant 0 : index
    %c0_5 = arith.constant 0 : index
    %4 = vector.load %arg2[%c0_4, %c0_5] : memref<3x128xf32, #tpu.memory_space<vmem>>, vector<1x128xf32>
    %5 = arith.addf %3, %4 : vector<1x128xf32>
    %6 = arith.negf %5 : vector<1x128xf32>
    %7 = math.exp %6 : vector<1x128xf32>
    %cst_6 = arith.constant 1.000000e+00 : f32
    %8 = vector.broadcast %cst_6 : f32 to vector<1x128xf32>
    %9 = arith.addf %8, %7 : vector<1x128xf32>
    %10 = arith.divf %8, %9 : vector<1x128xf32>
    %11 = vector.extract_strided_slice %10 {offsets = [0, 0], sizes = [1, 32], strides = [1, 1]} : vector<1x128xf32> to vector<1x32xf32>
    %12 = vector.extract_strided_slice %10 {offsets = [0, 32], sizes = [1, 32], strides = [1, 1]} : vector<1x128xf32> to vector<1x32xf32>
    %13 = vector.extract_strided_slice %10 {offsets = [0, 96], sizes = [1, 32], strides = [1, 1]} : vector<1x128xf32> to vector<1x32xf32>
    %14 = vector.extract_strided_slice %5 {offsets = [0, 64], sizes = [1, 32], strides = [1, 1]} : vector<1x128xf32> to vector<1x32xf32>
    %15 = math.tanh %14 : vector<1x32xf32>
    %16 = arith.mulf %12, %1 : vector<1x32xf32>
    %17 = arith.mulf %11, %15 : vector<1x32xf32>
    %18 = arith.addf %16, %17 : vector<1x32xf32>
    %19 = math.tanh %18 : vector<1x32xf32>
    %20 = arith.mulf %13, %19 : vector<1x32xf32>
    %cst_7 = arith.constant 0.000000e+00 : f32
    %21 = vector.broadcast %cst_7 : f32 to vector<1x32xf32>
    %22 = arith.maximumf %20, %21 : vector<1x32xf32>
    %23 = tpu.concatenate %22, %20 in 1 : vector<1x32xf32>, vector<1x32xf32> -> vector<1x64xf32>
    %c56 = arith.constant 56 : index
    %c0_8 = arith.constant 0 : index
    %24 = vector.load %arg1[%c56, %c0_8] : memref<152x128xf32, #tpu.memory_space<vmem>>, vector<64x128xf32>
    %cst_9 = arith.constant dense<0.000000e+00> : vector<1x128xf32>
    %25 = tpu.matmul %23, %24, %cst_9 {dimension_numbers = #tpu.dot_dimension_numbers<[1], [0], [0], [1], [0, 0, 1, 1], [], []>} : vector<1x64xf32>, vector<64x128xf32>, vector<1x128xf32> -> vector<1x128xf32>
    %c1_10 = arith.constant 1 : index
    %c0_11 = arith.constant 0 : index
    %26 = vector.load %arg2[%c1_10, %c0_11] : memref<3x128xf32, #tpu.memory_space<vmem>>, vector<1x128xf32>
    %27 = arith.addf %25, %26 : vector<1x128xf32>
    %28 = arith.negf %27 : vector<1x128xf32>
    %29 = math.exp %28 : vector<1x128xf32>
    %cst_12 = arith.constant 1.000000e+00 : f32
    %30 = vector.broadcast %cst_12 : f32 to vector<1x128xf32>
    %31 = arith.addf %30, %29 : vector<1x128xf32>
    %32 = arith.divf %30, %31 : vector<1x128xf32>
    %33 = vector.extract_strided_slice %32 {offsets = [0, 0], sizes = [1, 32], strides = [1, 1]} : vector<1x128xf32> to vector<1x32xf32>
    %34 = vector.extract_strided_slice %32 {offsets = [0, 32], sizes = [1, 32], strides = [1, 1]} : vector<1x128xf32> to vector<1x32xf32>
    %35 = vector.extract_strided_slice %32 {offsets = [0, 96], sizes = [1, 32], strides = [1, 1]} : vector<1x128xf32> to vector<1x32xf32>
    %36 = vector.extract_strided_slice %27 {offsets = [0, 64], sizes = [1, 32], strides = [1, 1]} : vector<1x128xf32> to vector<1x32xf32>
    %37 = math.tanh %36 : vector<1x32xf32>
    %38 = arith.mulf %34, %18 : vector<1x32xf32>
    %39 = arith.mulf %33, %37 : vector<1x32xf32>
    %40 = arith.addf %38, %39 : vector<1x32xf32>
    %41 = math.tanh %40 : vector<1x32xf32>
    %42 = arith.mulf %35, %41 : vector<1x32xf32>
    %c120 = arith.constant 120 : index
    %c0_13 = arith.constant 0 : index
    %43 = vector.load %arg1[%c120, %c0_13] : memref<152x128xf32, #tpu.memory_space<vmem>>, vector<32x128xf32>
    %cst_14 = arith.constant dense<0.000000e+00> : vector<1x128xf32>
    %44 = tpu.matmul %42, %43, %cst_14 {dimension_numbers = #tpu.dot_dimension_numbers<[1], [0], [0], [1], [0, 0, 1, 1], [], []>} : vector<1x32xf32>, vector<32x128xf32>, vector<1x128xf32> -> vector<1x128xf32>
    %c2 = arith.constant 2 : index
    %c0_15 = arith.constant 0 : index
    %45 = vector.load %arg2[%c2, %c0_15] : memref<3x128xf32, #tpu.memory_space<vmem>>, vector<1x128xf32>
    %46 = arith.addf %44, %45 : vector<1x128xf32>
    %cst_16 = arith.constant dense<0xFF800000> : vector<1xf32>
    %47 = vector.multi_reduction <maximumf>, %46, %cst_16 [1] : vector<1x128xf32> to vector<1xf32>
    %48 = vector.shape_cast %47 : vector<1xf32> to vector<1x1xf32>
    %49 = vector.broadcast %48 : vector<1x1xf32> to vector<1x128xf32>
    %50 = arith.subf %46, %49 : vector<1x128xf32>
    %51 = math.exp %50 : vector<1x128xf32>
    %cst_17 = arith.constant dense<0.000000e+00> : vector<1xf32>
    %52 = vector.multi_reduction <add>, %51, %cst_17 [1] : vector<1x128xf32> to vector<1xf32>
    %53 = vector.shape_cast %52 : vector<1xf32> to vector<1x1xf32>
    %54 = math.log %53 : vector<1x1xf32>
    %55 = arith.addf %48, %54 : vector<1x1xf32>
    %56 = vector.broadcast %55 : vector<1x1xf32> to vector<1x128xf32>
    %57 = arith.subf %46, %56 : vector<1x128xf32>
    %58 = vector.extract_strided_slice %57 {offsets = [0, 0], sizes = [1, 16], strides = [1, 1]} : vector<1x128xf32> to vector<1x16xf32>
    %cst_18 = arith.constant 0.000000e+00 : f32
    %59 = vector.broadcast %cst_18 : f32 to vector<1x48xf32>
    %60 = tpu.concatenate %58, %42, %40, %59 in 1 : vector<1x16xf32>, vector<1x32xf32>, vector<1x32xf32>, vector<1x48xf32> -> vector<1x128xf32>
    %c0_19 = arith.constant 0 : index
    %c0_20 = arith.constant 0 : index
    %61 = vector.load %arg3[%c0_19, %c0_20] : memref<1x128xf32, #tpu.memory_space<vmem>>, vector<1x128xf32>
    tpu.vector_store %arg3[%c0_19, %c0_20], %60 {strides = array<i32>} : memref<1x128xf32, #tpu.memory_space<vmem>>, vector<1x128xf32>,
    return
  }
}

</mosaic_0001>

<bundles_post_ra>
// kernel: tpu_custom_call.1
= control target key start
LH: loop header
LB: loop body
LE: loop exit
PB: predicated region body
PF: predicated region fallthrough
CT: control target
= control target key end

     0   :  { %8 = vsyncpa [#allocation3], 0  ;;  %s708_s0 = inlined_call_operand.hbm [shape: f32[2,128], index: 0, kind: input, shape index: {}]   ;;  %s709_s1 = inlined_call_operand.hbm [shape: f32[152,128], index: 1, kind: input, shape index: {}]   ;;  %s710_s2 = inlined_call_operand.vmem [shape: f32[3,128], index: 2, kind: input, shape index: {}]   ;;  %s711_s3 = inlined_call_operand.hbm [shape: f32[1,128], index: 3, kind: output, shape index: {}]  }
   0x1   :  { %9 = vsyncpa [#allocation6], 0 }
   0x2   :  { %10 = vsyncpa [#allocation4], 0  ;;  %s600_s12 = smov [#allocation2]   ;;  %s601_s14 = smov [#allocation5]  }
   0x3   :  { %s17_s13 = sshll.u32 %s600_s12, 4  ;;  %s26_s15 = sshll.u32 %s601_s14, 4  ;;  %s18_s13 = int_to_ptr.vmem [resolvable:$true] %s17_s13  ;;  %s632_s15 = int_to_ptr.vmem [resolvable:$true] %s26_s15 }
   0x4   :  { %s528_s18 = scalar_lea.hbm %s708_s0, 32 }
   0x5   :  { %p529_p0 = scmp.ne.s32.totalorder %s708_s0, %s528_s18  ;;  %p532_p1 = scmp.lt.u32.totalorder %s528_s18, %s708_s0 }
   0x7   :  { %p534_p2 = pnand %p532_p1, %p529_p0 }
   0x9   :  { %537 = shalt.err (!%p534_p2)
}
   0xa   :  { %s538_s23 = scalar_lea.vmem %s18_s13, 32  ;;  %p543_p4 = scmp.lt.s32.totalorder %s18_s13, %s18_s13 }
   0xb   :  { %p539_p3 = scmp.ne.s32.totalorder %s18_s13, %s538_s23  ;;  %p544_p5 = scmp.lt.s32.totalorder %s538_s23, %s538_s23 }
   0xd   :  { %p545_p6 = por %p544_p5, %p543_p4 }
   0xf   :  { %p546_p7 = pnand %p545_p6, %p539_p3 }
  0x11   :  { %549 = shalt.err (!%p546_p7)
}
  0x12   :  { %20 = dma.hbm_to_vmem [thread:$0]  %s708_s0, 32, %s18_s13, [#allocation3]  }
  0x13   :  { %s550_s28 = scalar_lea.hbm %s709_s1, 2432 }
  0x14   :  { %p551_p8 = scmp.ne.s32.totalorder %s709_s1, %s550_s28  ;;  %p554_p9 = scmp.lt.u32.totalorder %s550_s28, %s709_s1 }
  0x16   :  { %p556_p10 = pnand %p554_p9, %p551_p8 }
  0x18   :  { %559 = shalt.err (!%p556_p10)
}
  0x19   :  { %s560_s6 = scalar_lea.vmem %s632_s15, 2432  ;;  %p565_p12 = scmp.lt.s32.totalorder %s632_s15, %s632_s15 }
  0x1a   :  { %p561_p11 = scmp.ne.s32.totalorder %s632_s15, %s560_s6  ;;  %p566_p13 = scmp.lt.s32.totalorder %s560_s6, %s560_s6 }
  0x1c   :  { %p567_p0 = por %p566_p13, %p565_p12 }
  0x1e   :  { %p568_p1 = pnand %p567_p0, %p561_p11 }
  0x20   :  { %571 = shalt.err (!%p568_p1)
}
  0x21   :  { %s602_s0 = smov 128   ;;  %s603_s7 = smov 8  }
  0x22   :  { %32 = dma.hbm_to_vmem [thread:$0]  %s709_s1, 2432, %s632_s15, [#allocation6], %s602_s0, %s602_s0, %s603_s7  }
  0x23   :  { %594 = dma.done.wait [#allocation3], 32  }
  0x24   :  { %595 = vsyncadd [#allocation3], 4294967264 }
  0x25   :  { %596 = dma.done.wait [#allocation6], 2432  }
  0x26   :  { %597 = vsyncadd [#allocation6], 4294964864  ;;  %v604_v0 = vmov 0.0|0.0   ;;  %vm605_vm0 = vmmov 0   ;;  %v606_v1 = vmov 0.0   ;;  %v43_v2 = vld [vmem:[#allocation5] sm:$0xff] }
  0x27   :  { %469 = vmatprep.subr.bf16.mxu0 %v604_v0  ;;  %436 = vmatprep.mubr.msk.f32.mxu0 %vm605_vm0, %v606_v1  ;;  %v44_v3 = vld [vmem:[#allocation5 + $0x8] sm:$0xff]  ;;  %v45_v4 = vld [vmem:[#allocation5 + $0x10] sm:$0xff]  ;;  %v46_v6 = vld [vmem:[#allocation5 + $0x18] sm:$0xff]  ;;  %vm51_vm1 = vcmask 457728   ;;  %s607_s11 = smov 64   ;;  %s608_s12 = smov 32  }
  0x28   :  { %478 = vmatprep.subr.bf16.mxu1 %v604_v0  ;;  %455 = vmatprep.mubr.msk.f32.mxu1 %vm605_vm0, %v606_v1  ;;  %v470_v5 = vpack.c.bf16 %v44_v3, %v43_v2  ;;  %v473_v7 = vpack.c.bf16 %v46_v6, %v45_v4  ;;  %v47_v8 = vld [vmem:[#allocation5 + $0x20] sm:$0xff]  ;;  %v48_v9 = vld [vmem:[#allocation5 + $0x28] sm:$0xff]  ;;  %v49_v11 = vld [vmem:[#allocation5 + $0x30] sm:$0xff]  ;;  %vm162_vm2 = vcmask 261120   ;;  %vm173_vm3 = vcmask 523264   ;;  %s609_s17 = smov 48  }
  0x29   :  { %v476_v10 = vpack.c.bf16 %v48_v9, %v47_v8  ;;  %v41_v12 = vld [vmem:[#allocation2] sm:$0x1]  ;;  %v50_v13 = vld [vmem:[%s710_s2] sm:$0x1]  ;;  %v42_v18 = vld [vmem:[#allocation2 + $0x1] sm:$0x1] }
  0x2a   :  { %471 = vmatpush3.bf16.msra.mxu0 %v470_v5  ;;  %v164_v29 = vld [vmem:[#allocation5 + $0x38] sm:$0xff]  ;;  %v165_v30 = vld [vmem:[#allocation5 + $0x40] sm:$0xff]  ;;  %v166_v31 = vld [vmem:[#allocation5 + $0x48] sm:$0xff]  ;;  %vm351_vm4 = vcmask 1040384   ;;  %s610_s18 = smov 16   ;;  %vm372_vm5 = vcmask 130048  }
  0x2b   :  { %472 = vmatprep.subr.bf16.mxu0 %v604_v0  ;;  %v479_v32 = vpack.c.bf16 %v165_v30, %v164_v29  ;;  %v167_v33 = vld [vmem:[#allocation5 + $0x50] sm:$0xff]  ;;  %v168_v35 = vld [vmem:[#allocation5 + $0x58] sm:$0xff]  ;;  %v169_v36 = vld [vmem:[#allocation5 + $0x60] sm:$0xff]  ;;  %vm374_vm6 = vcmask 392192   ;;  %vm376_vm7 = vcmask 654336  }
  0x2c   :  { %v482_v34 = vpack.c.bf16 %v167_v33, %v166_v31  ;;  %v485_v37 = vpack.c.bf16 %v169_v36, %v168_v35  ;;  %v170_v39 = vld [vmem:[#allocation5 + $0x68] sm:$0xff]  ;;  %v171_v40 = vld [vmem:[#allocation5 + $0x70] sm:$0xff]  ;;  %v271_v62 = vld [vmem:[#allocation5 + $0x78] sm:$0xff] }
  0x2d   :  { %480 = vmatpush3.bf16.msra.mxu1 %v479_v32  ;;  %v488_v41 = vpack.c.bf16 %v171_v40, %v170_v39  ;;  %v172_v48 = vld [vmem:[%s710_s2 + $0x1] sm:$0x1]  ;;  %v272_v63 = vld [vmem:[#allocation5 + $0x80] sm:$0xff]  ;;  %v275_v9 = vld [vmem:[%s710_s2 + $0x2] sm:$0x1]  ;;  %s611_s2 = smov [#allocation7]  }
  0x2e   :  { %474 = vmatpush3.bf16.msra.mxu0 %v473_v7  ;;  %481 = vmatprep.subr.bf16.mxu1 %v604_v0  ;;  %v491_v2 = vpack.c.bf16 %v272_v63, %v271_v62  ;;  %v274_v3 = vld [vmem:[#allocation5 + $0x90] sm:$0xff]  ;;  %s385_s19 = sshll.u32 %s611_s2, 4  ;;  %s386_s19 = int_to_ptr.vmem [resolvable:$true] %s385_s19 }
  0x2f   :  { %475 = vmatprep.subr.bf16.mxu0 %v604_v0  ;;  %s572_s20 = scalar_lea.vmem %s386_s19, 16  ;;  %s576_s21 = scalar_lea.vmem %s386_s19, 32 }
  0x30   :  { %p573_p2 = scmp.ne.s32.totalorder %s386_s19, %s572_s20  ;;  %p577_p3 = scmp.lt.s32.totalorder %s386_s19, %s386_s19 }
  0x31   :  { %483 = vmatpush3.bf16.msra.mxu1 %v482_v34  ;;  %p578_p4 = scmp.lt.s32.totalorder %s576_s21, %s572_s20 }
  0x32   :  { %477 = vmatpush3.bf16.msra.mxu0 %v476_v10  ;;  %484 = vmatprep.subr.bf16.mxu1 %v604_v0 }
  0x33   :  { %434 = vmatprep.subr.mxu0 %v606_v1  ;;  %p579_p5 = por %p578_p4, %p577_p3 }
  0x35   :  { %486 = vmatpush3.bf16.msra.mxu1 %v485_v37  ;;  %p580_p6 = pnand %p579_p5, %p573_p2 }
  0x36   :  { %435 = vmatpush3.msra.mxu0 %v49_v11  ;;  %487 = vmatprep.subr.bf16.mxu1 %v604_v0 }
  0x37   :  { %437 = vmatmul.mubr.msk.f32.vlgmr.msra.gmra.mrb[0].mxu0 %vm51_vm1, %v41_v12  ;;  %490 = vmatprep.subr.bf16.mxu0 %v604_v0 }
  0x38   :  { %466 = vmatprep.mubr.msk.f32.mxu0 %vm605_vm0, %v606_v1  ;;  %v273_v1 = vld [vmem:[#allocation5 + $0x88] sm:$0xff]  ;;  %492 = vmatpush3.bf16.msra.mxu0 %v491_v2 }
  0x39   :  { %489 = vmatpush3.bf16.msra.mxu1 %v488_v41  ;;  %v494_v4 = vpack.c.bf16 %v274_v3, %v273_v1  ;;  %493 = vmatprep.subr.bf16.mxu0 %v604_v0 }
  0x3c   :  { %495 = vmatpush3.bf16.msra.mxu0 %v494_v4 }
 0x10a   :  { %v121_v14 = vpop.f32.mrb[0].mxu0 }
 0x10b   :  { %v122_v15 = vadd.f32 %v121_v14, %v50_v13  ;;  %v438_v16 = vpop.f32.mrb[1].mxu0 }
 0x10d   :  { %508 = vtanh.f32 %v122_v15  ;;  %v396_v19 = vmul.f32 -1.442695, %v122_v15 }
 0x10f   :  { %510 = vpow2.f32 %v396_v19 }
 0x117   :  { %v509_v17 = vpop.eup %508 }
 0x118   :  { %138 = vrot.lane.b32.xlu0 %v509_v17, %s607_s11 }
 0x119   :  { %v511_v20 = vpop.eup %510 }
 0x11a   :  { %v128_v21 = vadd.f32 1.0, %v511_v20 }
 0x11c   :  { %133 = vrot.lane.b32.xlu0 %v42_v18, %s608_s12  ;;  %512 = vrcp.f32 %v128_v21 }
 0x126   :  { %v513_v22 = vpop.eup %512 }
 0x18a   :  { %v139_v23 = vpop.permute.xlu0 %138 }
 0x18b   :  { %v141_v24 = vmul.f32 %v513_v22, %v139_v23 }
 0x18d   :  { %143 = vrot.lane.b32.xlu1 %v141_v24, %s608_s12 }
 0x18e   :  { %v134_v25 = vpop.permute.xlu0 %133 }
 0x18f   :  { %v136_v26 = vmul.f32 %v513_v22, %v134_v25 }
 0x1ff   :  { %v144_v27 = vpop.permute.xlu1 %143 }
 0x200   :  { %v146_v28 = vadd.f32 %v144_v27, %v136_v26 }
 0x202   :  { %514 = vtanh.f32 %v146_v28 }
 0x20c   :  { %v515_v38 = vpop.eup %514 }
 0x20d   :  { %149 = vrot.lane.b32.xlu1 %v515_v38, %s607_s11 }
 0x27f   :  { %v150_v42 = vpop.permute.xlu1 %149 }
 0x280   :  { %v152_v43 = vmul.f32 %v513_v22, %v150_v42 }
 0x282   :  { %v153_v44 = vmax.f32 %v152_v43, 0.0  ;;  %159 = vrot.lane.b32.xlu1 %v152_v43, %s607_s11 }
 0x284   :  { %155 = vrot.lane.b32.xlu0 %v153_v44, %s608_s12 }
 0x2f4   :  { %v160_v45 = vpop.permute.xlu1 %159 }
 0x2f6   :  { %v156_v46 = vpop.permute.xlu0 %155 }
 0x2f7   :  { %v163_v47 = vsel %vm162_vm2, %v156_v46, %v160_v45 }
 0x2f8   :  { %456 = vmatmul.mubr.msk.f32.vlgmr.msra.gmra.mrb[0].mxu1 %vm173_vm3, %v163_v47 }
 0x3cb   :  { %v243_v49 = vpop.f32.mrb[0].mxu1 }
 0x3cc   :  { %v244_v50 = vadd.f32 %v243_v49, %v172_v48  ;;  %v457_v51 = vpop.f32.mrb[1].mxu1 }
 0x3ce   :  { %516 = vtanh.f32 %v244_v50  ;;  %v398_v53 = vmul.f32 -1.442695, %v244_v50 }
 0x3d0   :  { %518 = vpow2.f32 %v398_v53 }
 0x3d8   :  { %v517_v52 = vpop.eup %516 }
 0x3d9   :  { %256 = vrot.lane.b32.xlu0 %v517_v52, %s607_s11 }
 0x3da   :  { %v519_v54 = vpop.eup %518 }
 0x3db   :  { %v250_v55 = vadd.f32 1.0, %v519_v54 }
 0x3dd   :  { %520 = vrcp.f32 %v250_v55 }
 0x3e7   :  { %v521_v56 = vpop.eup %520 }
 0x3e8   :  { %v254_v59 = vmul.f32 %v521_v56, %v146_v28 }
 0x44b   :  { %v257_v57 = vpop.permute.xlu0 %256 }
 0x44c   :  { %v259_v58 = vmul.f32 %v521_v56, %v257_v57 }
 0x44e   :  { %261 = vrot.lane.b32.xlu1 %v259_v58, %s608_s12 }
 0x4c0   :  { %v262_v60 = vpop.permute.xlu1 %261 }
 0x4c1   :  { %v264_v61 = vadd.f32 %v262_v60, %v254_v59 }
 0x4c3   :  { %522 = vtanh.f32 %v264_v61 }
 0x4cd   :  { %v523_v5 = vpop.eup %522 }
 0x4ce   :  { %267 = vrot.lane.b32.xlu0 %v523_v5, %s607_s11 }
 0x540   :  { %v268_v6 = vpop.permute.xlu0 %267 }
 0x541   :  { %v270_v7 = vmul.f32 %v521_v56, %v268_v6 }
 0x543   :  { %277 = vrot.lane.b32.xlu1 %v270_v7, %s608_s12 }
 0x5b5   :  { %v278_v8 = vpop.permute.xlu1 %277 }
 0x5b6   :  { %467 = vmatmul.mubr.msk.f32.vlgmr.msra.gmra.mrb[2].mxu0 %vm162_vm2, %v278_v8 }
 0x689   :  { %v347_v10 = vpop.f32.mrb[2].mxu0 }
 0x68a   :  { %v348_v11 = vadd.f32 %v347_v10, %v275_v9  ;;  %v468_v12 = vpop.f32.mrb[3].mxu0 }
 0x68c   :  { %v352_v0 = vsel %vm351_vm4, %v348_v11, -inf }
 0x68d   :  { %353 = vmax.xlane.f32.xlu0 %v352_v0 }
 0x6a3   :  { %365 = vrot.lane.b32.xlu0 %v270_v7, %s609_s17 }
 0x71a   :  { %v354_v13 = vpop.xlane.xlu0 %353 }
 0x71b   :  { %v355_v14 = vsub.f32 %v348_v11, %v354_v13 }
 0x71d   :  { %v356_v15 = vmul.f32 1.442695, %v355_v14 }
 0x71e   :  { %v366_v23 = vpop.permute.xlu0 %365 }
 0x71f   :  { %524 = vpow2.f32 %v356_v15 }
 0x729   :  { %v525_v16 = vpop.eup %524 }
 0x72a   :  { %v358_v17 = vsel %vm351_vm4, %v525_v16, 0.0 }
 0x72b   :  { %359 = vadd.xlane.f32.xlu1 %v358_v17 }
 0x73c   :  { %369 = vrot.lane.b32.xlu1 %v264_v61, %s610_s18 }
 0x7b8   :  { %v360_v18 = vpop.xlane.xlu1 %359 }
 0x7b9   :  { %526 = vlog2.f32 %v360_v18 }
 0x7bc   :  { %v370_v24 = vpop.permute.xlu1 %369 }
 0x7c3   :  { %v527_v19 = vpop.eup %526 }
 0x7c4   :  { %v362_v20 = vmul.f32 0.6931472, %v527_v19 }
 0x7c6   :  { %v363_v21 = vadd.f32 %v362_v20, %v354_v13 }
 0x7c8   :  { %v364_v22 = vsub.f32 %v348_v11, %v363_v21 }
 0x7ca   :  { %v373_v25 = vsel %vm372_vm5, %v364_v22, %v366_v23 }
 0x7cb   :  { %v375_v26 = vsel %vm374_vm6, %v373_v25, %v370_v24 }
 0x7cc   :  { %v377_v27 = vsel %vm376_vm7, %v375_v26, 0.0 }
 0x7cd   :  { %378 = vst [vmem:[#allocation7] sm:$0x1] %v377_v27 }
 0x7ce   :  { %583 = shalt.err (!%p580_p6)
}
 0x7cf   :  { %s584_s24 = scalar_lea.hbm %s711_s3, 16 }
 0x7d0   :  { %p585_p7 = scmp.ne.s32.totalorder %s711_s3, %s584_s24  ;;  %p588_p8 = scmp.lt.u32.totalorder %s584_s24, %s711_s3 }
 0x7d2   :  { %p590_p9 = pnand %p588_p8, %p585_p7 }
 0x7d4   :  { %593 = shalt.err (!%p590_p9)
}
 0x7d5   :  { %388 = dma.vmem_to_hbm [thread:$0]  %s386_s19, 16, %s711_s3, [#allocation4]  }
 0x7d6   :  { %598 = dma.done.wait [#allocation4], 16  }
 0x7d7   :  { %599 = vsyncadd [#allocation4], 4294967280 }
 0x7d8   :  { %392 = vsyncpa [#allocation3], 1 }
 0x7d9   :  { %393 = vsyncpa [#allocation6], 1 }
 0x7da   :  { %394 = vsyncpa [#allocation4], 1 }

</bundles_post_ra>
